<compile_context>
chip_gen: v7x
topology: tpu7x:2x2x1
jax: 0.10.0
libtpu: 0.0.40
codegen_flags: <defaults>
</compile_context>

<pallas_src>
import functools

import jax
import jax.numpy as jnp
from jax.experimental import pallas as pl
from jax.experimental.pallas import tpu as pltpu

EPSILON = 1.0  # matches `epsilon = 1` in the reference
_VMEM_LIMIT = 32 * 1024 * 1024  # explicit cap: safe on v5e/v6e (128 MiB) and v7x (64 MiB)


# ----------------------------------------------------------------------------
# Pallas kernels
# ----------------------------------------------------------------------------
def _gated_conv_kernel(xt_ref, w_ref, b_ref, o_ref):
    """Transposed fused gated temporal conv.

    xt_ref: (C, M)   im2col columns, features (channel, tap) on sublanes,
                     rows (slab, batch, node, time) on lanes.
    w_ref:  (2c, C)  stacked [W1; W2]  (single MXU push for both gates).
    b_ref:  (2c, 1)
    o_ref:  (c, M)   lane-dense output (M >> 128).
    """
    y = jnp.dot(w_ref[...], xt_ref[...], preferred_element_type=jnp.float32)
    y = y + b_ref[...]
    c = o_ref.shape[0]
    o_ref[...] = (y[:c, :] * y[c:, :]).astype(o_ref.dtype)


def gated_conv_pallas(xt, w_stack, b_stack):
    """(W1@Xt + b1) * (W2@Xt + b2) in one pallas_call, single full-array block."""
    C, M = xt.shape
    out_c = w_stack.shape[0] // 2
    return pl.pallas_call(
        _gated_conv_kernel,
        out_shape=jax.ShapeDtypeStruct((out_c, M), xt.dtype),
        grid=(1,),
        in_specs=[
            pl.BlockSpec((C, M), lambda i: (0, 0)),
            pl.BlockSpec((2 * out_c, C), lambda i: (0, 0)),
            pl.BlockSpec((2 * out_c, 1), lambda i: (0, 0)),
        ],
        out_specs=pl.BlockSpec((out_c, M), lambda i: (0, 0)),
        compiler_params=pltpu.CompilerParams(
            dimension_semantics=("arbitrary",),
            vmem_limit_bytes=_VMEM_LIMIT,
        ),
    )(xt, w_stack, b_stack)


def gated_conv_ref(xt, w_stack, b_stack):
    out_c = w_stack.shape[0] // 2
    y = jnp.dot(w_stack, xt) + b_stack
    return y[:out_c, :] * y[out_c:, :]


def _batched_mm_kernel(x_ref, w_ref, b_ref, o_ref):
    # x_ref: (1, R, K), w_ref: (1, K, N), b_ref: (1, 1, N), o_ref: (1, R, N)
    y = jnp.dot(x_ref[0], w_ref[0], preferred_element_type=jnp.float32) + b_ref[0]
    o_ref[0] = y.astype(o_ref.dtype)


def batched_matmul_bias_pallas(x, w, b):
    """Batched (G,R,K)@(G,K,N)+(G,1,N); one pallas_call, grid over G."""
    G, R, K = x.shape
    N = w.shape[2]
    return pl.pallas_call(
        _batched_mm_kernel,
        out_shape=jax.ShapeDtypeStruct((G, R, N), x.dtype),
        grid=(G,),
        in_specs=[
            pl.BlockSpec((1, R, K), lambda i: (i, 0, 0)),
            pl.BlockSpec((1, K, N), lambda i: (i, 0, 0)),
            pl.BlockSpec((1, 1, N), lambda i: (i, 0, 0)),
        ],
        out_specs=pl.BlockSpec((1, R, N), lambda i: (i, 0, 0)),
        compiler_params=pltpu.CompilerParams(
            dimension_semantics=("parallel",),  # G=4 is even -> both v7x TCs busy
            vmem_limit_bytes=_VMEM_LIMIT,
        ),
    )(x, w, b)


def batched_matmul_bias_ref(x, w, b):
    return jnp.einsum("gmk,gkn->gmn", x, w) + b


# ----------------------------------------------------------------------------
# Glue that mirrors the PyTorch helpers (shapes/axes identical to torch code)
# ----------------------------------------------------------------------------
def constant_extrapolate(x, num_pred):
    # replicate-pad the last (time) dim on the right
    return jnp.concatenate(
        [x, jnp.repeat(x[..., -1:], num_pred, axis=-1)], axis=-1)


def seasonal_extrapolate(x, num_pred):
    # circular-pad the last (time) dim on the right
    return jnp.concatenate([x, x[..., :num_pred]], axis=-1)


def term_norm(x, term_length):
    b, c, n, t = x.shape
    L = term_length
    win = jnp.stack([x[..., j:j + t - L + 1] for j in range(L)], axis=-1)
    mean_w = win.mean(-1)
    var_w = (win ** 2).mean(-1) - mean_w ** 2 + 1e-5
    # left replicate-pad by (L - 1)
    mean = jnp.concatenate(
        [jnp.repeat(mean_w[..., :1], L - 1, axis=-1), mean_w], axis=-1)
    var = jnp.concatenate(
        [jnp.repeat(var_w[..., :1], L - 1, axis=-1), var_w], axis=-1)
    out = (x - mean) / (var + EPSILON) ** 0.5
    return out, mean, var ** 0.5


def seasonal_norm(x, period_length):
    b, c, n, t = x.shape
    P = period_length
    assert t % P == 0, "t must be divisible by period_length (equal torch.split)"
    xp = x.reshape(b, c, n, t // P, P)
    mean_p = xp.mean(3)
    var_p = (xp ** 2).mean(3) - mean_p ** 2 + 1e-5
    mean = jnp.tile(mean_p, (1, 1, 1, t // P))
    var = jnp.tile(var_p, (1, 1, 1, t // P))
    # circular pad of (t % P, 0) is a no-op since t % P == 0
    out = (x - mean) / (var + EPSILON) ** 0.5
    return out, mean, var ** 0.5


def ada_spatial_norm(x, node_embedding):
    # adjacency matmul is 8x8 @ 8x(b*t*c): kept in plain JAX per perf review.
    b, c, n, t = x.shape
    adj = node_embedding @ node_embedding.T - 10.0 * jnp.eye(n, dtype=x.dtype)
    adj = jax.nn.softmax(adj, axis=-1)
    x_f = jnp.transpose(x, (0, 3, 2, 1)).reshape(b * t, n, c)
    mean_f = jnp.einsum("ij,bjc->bic", adj, x_f)
    var_f = jnp.einsum("ij,bjc->bic", adj, x_f ** 2) - mean_f ** 2 + 1e-5
    mean = jnp.transpose(mean_f.reshape(b, t, n, c), (0, 3, 2, 1))
    var = jnp.transpose(var_f.reshape(b, t, n, c), (0, 3, 2, 1))
    out = (x - mean) / (var + EPSILON) ** 0.5
    return out, mean, var ** 0.5


def batched_residual_extrapolate(xs, w_stack, b_stack, num_pred, use_pallas):
    """All four ResidualExtrapolate projections (Conv2d c -> c*num_pred, (1,5))
    batched into a single Pallas call over a grid of 4."""
    b, c, n, t = xs[0].shape
    tails = jnp.stack(
        [jnp.transpose(xi[..., -5:], (0, 2, 1, 3)).reshape(b * n, c * 5)
         for xi in xs], axis=0)                               # (4, b*n, c*5), feat=(ci,k)
    mm = batched_matmul_bias_pallas if use_pallas else batched_matmul_bias_ref
    y = mm(tails, w_stack, b_stack)                           # (4, b*n, c*num_pred)
    outs = []
    for i, xi in enumerate(xs):
        # column order (num_pred, c) matches torch's reshape(b, num_pred, c, n)
        proj = jnp.transpose(y[i].reshape(b, n, num_pred, c), (0, 3, 1, 2))
        outs.append(jnp.concatenate([xi, proj], axis=-1))     # (b, c, n, t+num_pred)
    return outs


def im2col_T(x, K):
    """(B, C, n, T) -> (C*K, B*n*T_out) transposed im2col; feature order (ci, k)."""
    B, C, n, T = x.shape
    T_out = T - K + 1
    taps = jnp.stack([x[..., k:k + T_out] for k in range(K)], axis=2)  # (B,C,K,n,T_out)
    xt = jnp.transpose(taps, (1, 2, 0, 3, 4)).reshape(C * K, B * n * T_out)
    return xt, T_out


def pointwise_conv(x, w, bias):
    # 1x1 Conv2d with K=N=c=4: plain JAX (XLA fuses it) per perf review.
    return jnp.einsum("bcnt,cd->bdnt", x, w) + bias[None, :, None, None]


# ----------------------------------------------------------------------------
# SCLayer forward
# ----------------------------------------------------------------------------
def sc_layer_forward(x, params, cfg, use_pallas=True):
    b, c, n, t = x.shape
    num_pred = cfg["num_pred"]
    K = cfg["num_local_input"]

    # residual = x ; z0 = x[..., -1] ; scale_conv -> dead in the reference
    # forward, intentionally omitted.

    # --- normalization cascade (cheap reductions / reshapes: plain JAX glue) ---
    x0_proj = constant_extrapolate(x, num_pred)
    x_ln, lt_mean, lt_std = term_norm(x, cfg["long_term"])
    x_sn, se_mean, se_std = seasonal_norm(x_ln, cfg["period_length"])
    x_st, st_mean, st_std = term_norm(x_sn, cfg["short_term"])
    x_sp, sp_mean, sp_std = ada_spatial_norm(x_st, params["node_embedding"])

    # --- all four residual-extrapolate projections in ONE Pallas call ---
    x_proj1, x_proj2, x_proj3, x_proj4 = batched_residual_extrapolate(
        [x_ln, x_sn, x_st, x_sp], params["re_w"], params["re_b"],
        num_pred, use_pallas)

    lt_mean_p = constant_extrapolate(lt_mean, num_pred)
    lt_std_p = constant_extrapolate(lt_std, num_pred)
    se_mean_p = seasonal_extrapolate(se_mean, num_pred)
    se_std_p = seasonal_extrapolate(se_std, num_pred)
    st_mean_p = constant_extrapolate(st_mean, num_pred)
    st_std_p = constant_extrapolate(st_std, num_pred)
    sp_mean_p = constant_extrapolate(sp_mean, num_pred)
    sp_std_p = constant_extrapolate(sp_std, num_pred)

    zeros = jnp.zeros_like(x0_proj)
    xs = [x0_proj,
          x_proj1, lt_mean_p, lt_std_p,
          x_proj2, se_mean_p, se_std_p,
          x_proj3, st_mean_p, st_std_p,
          x_proj4, sp_mean_p, sp_std_p]
    aux = [zeros,
           zeros, lt_mean_p, lt_std_p,
           zeros, se_mean_p, se_std_p,
           zeros, st_mean_p, st_std_p,
           zeros, sp_mean_p, sp_std_p]

    xcat = jnp.concatenate(xs, axis=1)        # (b, 13c, n, t + num_pred)
    auxcat = jnp.concatenate(aux, axis=1)

    # x and aux share conv_1/conv_2: fuse both into a single gated-conv call by
    # stacking them along the leading (slab) axis before im2col.
    xall = jnp.concatenate([xcat, auxcat], axis=0)             # (2b, 13c, n, t+num_pred)
    # F.pad(..., pad=(1, 0)) : one zero on the left of the time axis
    xall = jnp.pad(xall, ((0, 0), (0, 0), (0, 0), (1, 0)))

    xt, T_out = im2col_T(xall, K)                              # (13c*K, 2b*n*T_out)

    if use_pallas:
        g = gated_conv_pallas(xt, params["conv_w"], params["conv_b"])
    else:
        g = gated_conv_ref(xt, params["conv_w"], params["conv_b"])
    # g: (c, 2*b*n*T_out), columns ordered (slab, batch, node, time)
    g = g.reshape(c, 2, b, n, T_out)
    g_x = jnp.transpose(g[:, 0], (1, 0, 2, 3))                 # (b, c, n, T_out)
    g_aux = jnp.transpose(g[:, 1], (1, 0, 2, 3))

    x_z = g_x[..., :-num_pred]
    pred_z = g_x[..., -num_pred:]
    pred_aux_z = g_aux[..., -num_pred:]

    s = pointwise_conv(pred_z, params["skip_w"], params["skip_b"])
    s_aux = pointwise_conv(pred_aux_z, params["skip_w"], params["skip_b"])
    x_z = pointwise_conv(x_z, params["res_w"], params["res_b"])
    return x_z, s_aux, s


# ----------------------------------------------------------------------------
# Deterministic parameter init (shapes from SCLayer.__init__)
# ----------------------------------------------------------------------------
def init_params(key, cfg):
    c = cfg["channels"]
    n = cfg["num_nodes"]
    K = cfg["num_local_input"]
    num_pred = cfg["num_pred"]
    emb = cfg["embedding_dim"]
    ks = jax.random.split(key, 12)

    def w(k, shape, fan_in):
        return jax.random.normal(k, shape, jnp.float32) / jnp.sqrt(fan_in)

    p = {}
    # NOTE: torch init is zeros for node_embedding; small randoms keep the
    # spatial softmax non-degenerate (deterministic, shapes identical).
    p["node_embedding"] = 0.1 * jax.random.normal(ks[0], (n, emb), jnp.float32)
    # Four ResidualExtrapolate proj_maps stacked: (4, c*5, c*num_pred).
    # Row order (ci, k); column order (num_pred, c) matches torch's flattening.
    p["re_w"] = w(ks[1], (4, c * 5, c * num_pred), c * 5)
    p["re_b"] = 0.01 * jax.random.normal(ks[2], (4, 1, c * num_pred), jnp.float32)
    # conv_1 / conv_2 stacked along rows: (2c, 13c*K), column order (ci, k).
    p["conv_w"] = w(ks[3], (2 * c, 13 * c * K), 13 * c * K)
    p["conv_b"] = 0.01 * jax.random.normal(ks[4], (2 * c, 1), jnp.float32)
    p["skip_w"] = w(ks[5], (c, c), c)
    p["skip_b"] = 0.01 * jax.random.normal(ks[6], (c,), jnp.float32)
    p["res_w"] = w(ks[7], (c, c), c)
    p["res_b"] = 0.01 * jax.random.normal(ks[8], (c,), jnp.float32)
    # scale_conv exists in __init__ but is unused in forward; omitted.
    return p


if __name__ == "__main__":
    cfg = dict(
        num_local_input=4,
        num_pred=4,
        num_nodes=8,
        period_length=4,
        short_term=3,
        long_term=8,
        channels=4,
        skip_channels=8,     # unused by the reference forward
        embedding_dim=8,
    )
    b, c, n, t = 2, cfg["channels"], cfg["num_nodes"], 16

    key = jax.random.PRNGKey(0)
    kx, kp = jax.random.split(key)
    x = jax.random.normal(kx, (b, c, n, t), jnp.float32)
    params = init_params(kp, cfg)

    fwd_pallas = jax.jit(functools.partial(sc_layer_forward, cfg=cfg, use_pallas=True))
    fwd_ref = jax.jit(functools.partial(sc_layer_forward, cfg=cfg, use_pallas=False))

    x_z, s_aux, s = fwd_pallas(x, params)
    jax.block_until_ready((x_z, s_aux, s))

    # Self-check against a pure-JAX reference of the same math.
    x_z_r, s_aux_r, s_r = fwd_ref(x, params)
    jax.block_until_ready((x_z_r, s_aux_r, s_r))

    assert x_z.shape == (b, c, n, t + 2 - cfg["num_local_input"])
    assert s.shape == (b, c, n, cfg["num_pred"])
    assert s_aux.shape == (b, c, n, cfg["num_pred"])
    for a, r in ((x_z, x_z_r), (s_aux, s_aux_r), (s, s_r)):
        assert bool(jnp.all(jnp.isfinite(a)))
        # MXU vs XLA dot rounding can differ slightly -> 1e-3 tolerance.
        assert bool(jnp.allclose(a, r, rtol=1e-3, atol=1e-3))

    print("KERNEL_OK")
</pallas_src>

<mosaic_0001>
module attributes {stable_mosaic.version = 11 : i64} {
  func.func @_batched_mm_kernel(%arg0: i32, %arg1: memref<1x16x20xf32, #tpu.memory_space<vmem>>, %arg2: memref<1x20x16xf32, #tpu.memory_space<vmem>>, %arg3: memref<1x1x16xf32, #tpu.memory_space<vmem>>, %arg4: memref<1x16x16xf32, #tpu.memory_space<vmem>>) attributes {dimension_semantics = [#tpu.dimension_semantics<parallel>], iteration_bounds = array<i64: 4>, scalar_prefetch = 0 : i64, scratch_operands = 0 : i64, tpu.core_type = #tpu.core_type<tc>, window_params = [{transform_indices = @transform_0, window_bounds = array<i64: 1, 16, 20>}, {transform_indices = @transform_1, window_bounds = array<i64: 1, 20, 16>}, {transform_indices = @transform_2, window_bounds = array<i64: 1, 1, 16>}, {transform_indices = @transform_3, window_bounds = array<i64: 1, 16, 16>}]} {
    %c0 = arith.constant 0 : index
    %c0_0 = arith.constant 0 : index
    %c0_1 = arith.constant 0 : index
    %0 = vector.load %arg1[%c0, %c0_0, %c0_1] : memref<1x16x20xf32, #tpu.memory_space<vmem>>, vector<1x16x20xf32>
    %1 = vector.shape_cast %0 : vector<1x16x20xf32> to vector<16x20xf32>
    %c0_2 = arith.constant 0 : index
    %c0_3 = arith.constant 0 : index
    %c0_4 = arith.constant 0 : index
    %2 = vector.load %arg2[%c0_2, %c0_3, %c0_4] : memref<1x20x16xf32, #tpu.memory_space<vmem>>, vector<1x20x16xf32>
    %3 = vector.shape_cast %2 : vector<1x20x16xf32> to vector<20x16xf32>
    %cst = arith.constant dense<0.000000e+00> : vector<16x16xf32>
    %4 = tpu.matmul %1, %3, %cst {dimension_numbers = #tpu.dot_dimension_numbers<[1], [0], [0], [1], [0, 0, 1, 1], [], []>} : vector<16x20xf32>, vector<20x16xf32>, vector<16x16xf32> -> vector<16x16xf32>
    %c0_5 = arith.constant 0 : index
    %c0_6 = arith.constant 0 : index
    %c0_7 = arith.constant 0 : index
    %5 = vector.load %arg3[%c0_5, %c0_6, %c0_7] : memref<1x1x16xf32, #tpu.memory_space<vmem>>, vector<1x1x16xf32>
    %6 = vector.shape_cast %5 : vector<1x1x16xf32> to vector<1x16xf32>
    %7 = vector.broadcast %6 : vector<1x16xf32> to vector<16x16xf32>
    %8 = arith.addf %4, %7 : vector<16x16xf32>
    %c0_8 = arith.constant 0 : index
    %c0_9 = arith.constant 0 : index
    %c0_10 = arith.constant 0 : index
    %9 = vector.load %arg4[%c0_8, %c0_9, %c0_10] : memref<1x16x16xf32, #tpu.memory_space<vmem>>, vector<1x16x16xf32>
    %10 = vector.shape_cast %9 : vector<1x16x16xf32> to vector<16x16xf32>
    %11 = vector.shape_cast %8 : vector<16x16xf32> to vector<1x16x16xf32>
    tpu.vector_store %arg4[%c0_8, %c0_9, %c0_10], %11 {strides = array<i32>} : memref<1x16x16xf32, #tpu.memory_space<vmem>>, vector<1x16x16xf32>,
    return
  }
  func.func @transform_0(%arg0: i32) -> (i32, i32, i32) {
    %c0_i32 = arith.constant 0 : i32
    %c0_i32_0 = arith.constant 0 : i32
    %c0_i32_1 = arith.constant 0 : i32
    return %arg0, %c0_i32, %c0_i32_0 : i32, i32, i32
  }
  func.func @transform_1(%arg0: i32) -> (i32, i32, i32) {
    %c0_i32 = arith.constant 0 : i32
    %c0_i32_0 = arith.constant 0 : i32
    %c0_i32_1 = arith.constant 0 : i32
    return %arg0, %c0_i32, %c0_i32_0 : i32, i32, i32
  }
  func.func @transform_2(%arg0: i32) -> (i32, i32, i32) {
    %c0_i32 = arith.constant 0 : i32
    %c0_i32_0 = arith.constant 0 : i32
    %c0_i32_1 = arith.constant 0 : i32
    return %arg0, %c0_i32, %c0_i32_0 : i32, i32, i32
  }
  func.func @transform_3(%arg0: i32) -> (i32, i32, i32) {
    %c0_i32 = arith.constant 0 : i32
    %c0_i32_0 = arith.constant 0 : i32
    %c0_i32_1 = arith.constant 0 : i32
    return %arg0, %c0_i32, %c0_i32_0 : i32, i32, i32
  }
}

module attributes {stable_mosaic.version = 11 : i64} {
  func.func @_gated_conv_kernel(%arg0: i32, %arg1: memref<208x576xf32, #tpu.memory_space<vmem>>, %arg2: memref<8x208xf32, #tpu.memory_space<vmem>>, %arg3: memref<8x1xf32, #tpu.memory_space<vmem>>, %arg4: memref<4x576xf32, #tpu.memory_space<vmem>>) attributes {dimension_semantics = [#tpu.dimension_semantics<arbitrary>], iteration_bounds = array<i64: 1>, scalar_prefetch = 0 : i64, scratch_operands = 0 : i64, tpu.core_type = #tpu.core_type<tc>, window_params = [{pipeline_mode = #tpu.pipeline_mode<synchronous>, transform_indices = @transform_0, window_bounds = array<i64: 208, 576>}, {pipeline_mode = #tpu.pipeline_mode<synchronous>, transform_indices = @transform_1, window_bounds = array<i64: 8, 208>}, {pipeline_mode = #tpu.pipeline_mode<synchronous>, transform_indices = @transform_2, window_bounds = array<i64: 8, 1>}, {pipeline_mode = #tpu.pipeline_mode<synchronous>, transform_indices = @transform_3, window_bounds = array<i64: 4, 576>}]} {
    %c0 = arith.constant 0 : index
    %c0_0 = arith.constant 0 : index
    %0 = vector.load %arg2[%c0, %c0_0] : memref<8x208xf32, #tpu.memory_space<vmem>>, vector<8x208xf32>
    %c0_1 = arith.constant 0 : index
    %c0_2 = arith.constant 0 : index
    %1 = vector.load %arg1[%c0_1, %c0_2] : memref<208x576xf32, #tpu.memory_space<vmem>>, vector<208x576xf32>
    %cst = arith.constant dense<0.000000e+00> : vector<8x576xf32>
    %2 = tpu.matmul %0, %1, %cst {dimension_numbers = #tpu.dot_dimension_numbers<[1], [0], [0], [1], [0, 0, 1, 1], [], []>} : vector<8x208xf32>, vector<208x576xf32>, vector<8x576xf32> -> vector<8x576xf32>
    %c0_3 = arith.constant 0 : index
    %c0_4 = arith.constant 0 : index
    %3 = vector.load %arg3[%c0_3, %c0_4] : memref<8x1xf32, #tpu.memory_space<vmem>>, vector<8x1xf32>
    %4 = vector.broadcast %3 : vector<8x1xf32> to vector<8x576xf32>
    %5 = arith.addf %2, %4 : vector<8x576xf32>
    %6 = vector.extract_strided_slice %5 {offsets = [0, 0], sizes = [4, 576], strides = [1, 1]} : vector<8x576xf32> to vector<4x576xf32>
    %7 = vector.extract_strided_slice %5 {offsets = [4, 0], sizes = [4, 576], strides = [1, 1]} : vector<8x576xf32> to vector<4x576xf32>
    %8 = arith.mulf %6, %7 : vector<4x576xf32>
    %c0_5 = arith.constant 0 : index
    %c0_6 = arith.constant 0 : index
    %9 = vector.load %arg4[%c0_5, %c0_6] : memref<4x576xf32, #tpu.memory_space<vmem>>, vector<4x576xf32>
    tpu.vector_store %arg4[%c0_5, %c0_6], %8 {strides = array<i32>} : memref<4x576xf32, #tpu.memory_space<vmem>>, vector<4x576xf32>,
    return
  }
  func.func @transform_0(%arg0: i32) -> (i32, i32) {
    %c0_i32 = arith.constant 0 : i32
    %c0_i32_0 = arith.constant 0 : i32
    %c0_i32_1 = arith.constant 0 : i32
    return %c0_i32, %c0_i32_0 : i32, i32
  }
  func.func @transform_1(%arg0: i32) -> (i32, i32) {
    %c0_i32 = arith.constant 0 : i32
    %c0_i32_0 = arith.constant 0 : i32
    %c0_i32_1 = arith.constant 0 : i32
    return %c0_i32, %c0_i32_0 : i32, i32
  }
  func.func @transform_2(%arg0: i32) -> (i32, i32) {
    %c0_i32 = arith.constant 0 : i32
    %c0_i32_0 = arith.constant 0 : i32
    %c0_i32_1 = arith.constant 0 : i32
    return %c0_i32, %c0_i32_0 : i32, i32
  }
  func.func @transform_3(%arg0: i32) -> (i32, i32) {
    %c0_i32 = arith.constant 0 : i32
    %c0_i32_0 = arith.constant 0 : i32
    %c0_i32_1 = arith.constant 0 : i32
    return %c0_i32, %c0_i32_0 : i32, i32
  }
}

</mosaic_0001>

<bundles_post_ra>
// kernel: squeeze.8
= control target key start
LH: loop header
LB: loop body
LE: loop exit
PB: predicated region body
PF: predicated region fallthrough
CT: control target
= control target key end

     0   :  { %vm3_vm0 = vcmask 64512   ;;  %s222_s0 = inlined_call_operand.vmem [shape: f32[1,16,16], index: 0, kind: input, shape index: {}]   ;;  %s223_s1 = inlined_call_operand.vmem [shape: f32[2,8,4,4], index: 1, kind: output, shape index: {}]  }
   0x1   :  { %v13_v0 = vld [vmem:[%s222_s0] sm:$0xff]   ;;  %v140_v1 = vld [vmem:[%s222_s0 + $0x8] sm:$0xff]   ;;  %s157_s0 = smov 120  }
   0x2   :  { %14 = vrot.lane.b32.xlu0 %v13_v0, %s157_s0  ;;  %4 = vst.msk [vmem:[#allocation0] ss:$8 sm:$0xf] %vm3_vm0, %v13_v0   ;;  %5 = vst.msk [vmem:[#allocation0] ss:$8 sm:$0xf0] %vm3_vm0, %v13_v0  }
   0x3   :  { %10 = vst.msk [vmem:[#allocation0 + $0x40] ss:$8 sm:$0xf] %vm3_vm0, %v140_v1   ;;  %12 = vst.msk [vmem:[#allocation0 + $0x40] ss:$8 sm:$0xf0] %vm3_vm0, %v140_v1  }
   0x6   :  { %23 = vrot.lane.b32.xlu0 %v140_v1, %s157_s0 }
  0x74   :  { %v15_v2 = vpop.permute.xlu0 %14  }
  0x75   :  { %18 = vst.msk [vmem:[#allocation0 + $0x1] ss:$8 sm:$0xf] %vm3_vm0, %v15_v2   ;;  %20 = vst.msk [vmem:[#allocation0 + $0x1] ss:$8 sm:$0xf0] %vm3_vm0, %v15_v2  }
  0x78   :  { %v24_v3 = vpop.permute.xlu0 %23  }
  0x79   :  { %27 = vst.msk [vmem:[#allocation0 + $0x41] ss:$8 sm:$0xf] %vm3_vm0, %v24_v3   ;;  %29 = vst.msk [vmem:[#allocation0 + $0x41] ss:$8 sm:$0xf0] %vm3_vm0, %v24_v3  }
  0x7c   :  { %v33_v4 = vld [vmem:[#allocation0] sm:$0x3]  ;;  %v37_v5 = vld [vmem:[#allocation0 + $0x8] sm:$0x3]  ;;  %v42_v6 = vld [vmem:[#allocation0 + $0x10] sm:$0x3] }
  0x7d   :  { %35 = vst [vmem:[%s223_s1] sm:$0x3] %v33_v4  ;;  %141 = vst [vmem:[%s223_s1 + $0x2] sm:$0x3] %v37_v5  ;;  %v48_v7 = vld [vmem:[#allocation0 + $0x18] sm:$0x3] }
  0x7e   :  { %142 = vst [vmem:[%s223_s1 + $0x4] sm:$0x3] %v42_v6  ;;  %v54_v8 = vld [vmem:[#allocation0 + $0x20] sm:$0x3]  ;;  %v60_v9 = vld [vmem:[#allocation0 + $0x28] sm:$0x3] }
  0x7f   :  { %143 = vst [vmem:[%s223_s1 + $0x6] sm:$0x3] %v48_v7  ;;  %144 = vst [vmem:[%s223_s1 + $0x8] sm:$0x3] %v54_v8  ;;  %v66_v10 = vld [vmem:[#allocation0 + $0x30] sm:$0x3] }
  0x80   :  { %145 = vst [vmem:[%s223_s1 + $0xa] sm:$0x3] %v60_v9  ;;  %v72_v11 = vld [vmem:[#allocation0 + $0x38] sm:$0x3]  ;;  %146 = vst [vmem:[%s223_s1 + $0xc] sm:$0x3] %v66_v10 }
  0x81   :  { %147 = vst [vmem:[%s223_s1 + $0xe] sm:$0x3] %v72_v11  ;;  %v78_v12 = vld [vmem:[#allocation0 + $0x40] sm:$0x3]  ;;  %v84_v13 = vld [vmem:[#allocation0 + $0x48] sm:$0x3] }
  0x82   :  { %v90_v14 = vld [vmem:[#allocation0 + $0x50] sm:$0x3]  ;;  %148 = vst [vmem:[%s223_s1 + $0x10] sm:$0x3] %v78_v12  ;;  %149 = vst [vmem:[%s223_s1 + $0x12] sm:$0x3] %v84_v13 }
  0x83   :  { %150 = vst [vmem:[%s223_s1 + $0x14] sm:$0x3] %v90_v14  ;;  %v96_v15 = vld [vmem:[#allocation0 + $0x58] sm:$0x3]  ;;  %v102_v16 = vld [vmem:[#allocation0 + $0x60] sm:$0x3] }
  0x84   :  { %v108_v17 = vld [vmem:[#allocation0 + $0x68] sm:$0x3]  ;;  %151 = vst [vmem:[%s223_s1 + $0x16] sm:$0x3] %v96_v15  ;;  %152 = vst [vmem:[%s223_s1 + $0x18] sm:$0x3] %v102_v16 }
  0x85   :  { %153 = vst [vmem:[%s223_s1 + $0x1a] sm:$0x3] %v108_v17  ;;  %v114_v18 = vld [vmem:[#allocation0 + $0x70] sm:$0x3]  ;;  %v120_v19 = vld [vmem:[#allocation0 + $0x78] sm:$0x3] }
  0x86   :  { %154 = vst [vmem:[%s223_s1 + $0x1c] sm:$0x3] %v114_v18  ;;  %155 = vst [vmem:[%s223_s1 + $0x1e] sm:$0x3] %v120_v19 }

// kernel: sc_layer_forward.2
= control target key start
LH: loop header
LB: loop body
LE: loop exit
PB: predicated region body
PF: predicated region fallthrough
CT: control target
= control target key end

     0   :  { %s455_s12 = smov 0   ;;  %s478_s0 = inlined_call_operand.vmem [shape: f32[4,16,20], index: 0, kind: input, shape index: {}]   ;;  %s479_s1 = inlined_call_operand.vmem [shape: f32[4,20,16], index: 1, kind: input, shape index: {}]   ;;  %s480_s2 = inlined_call_operand.vmem [shape: f32[4,1,16], index: 2, kind: input, shape index: {}]   ;;  %s481_s3 = inlined_call_operand.vmem [shape: f32[4,16,16], index: 3, kind: output, shape index: {}]  }
   0x1 LB: > { %s382_s13 = sadd.s32 4294967295, %s433_s12   ;;  %p386_p0 = scmp.ge.s32.totalorder %s433_s12, 1  ;;  %s433_s12 = sphi %s455_s12, %s13_s12  }
   0x2   : > { %p155_p1 = scmp.lt.s32.totalorder %s433_s12, 5 }
   0x4   : > { %p156_p2 = pnand %p386_p0, %p155_p1 }
   0x5   : > { %p187_p3 = scmp.lt.s32.totalorder (!%p156_p2), %s382_s13, 3  ;;  %vm217_vm0 = vcmask (!%p156_p2), 162816   ;;  %vm224_vm1 = vcmask (!%p156_p2), 1043456   ;;  %vm303_vm2 = vcmask (!%p156_p2), 130048  }
   0x6   : > { %159 = sbr.rel (%p156_p2) target bundleno = 242 (0xf2), region = 32 }
   0xd   : > { %s483_s13 = smov (!%p187_p3, %s382_s13), 3 }
   0xe   : > { %s418_s14 = smul.u32 24, %s483_s13  ;;  %s398_s15 = sshll.u32 %s483_s13, 4 }
   0xf   : > { %s191_s18 = scalar_lea.vmem %s478_s0, %s398_s15  ;;  %s199_s24 = scalar_lea.vmem %s480_s2, %s483_s13 }
  0x10   : > { %s196_s21 = scalar_lea.vmem %s479_s1, %s418_s14  ;;  %v205_v0 = vld [vmem:[%s191_s18] sm:$0xff]  ;;  %v206_v5 = vld [vmem:[%s191_s18 + $0x8] sm:$0xff]  ;;  %s204_s27 = scalar_lea.vmem %s481_s3, %s398_s15 }
  0x11   : > { %v207_v1 = vld [vmem:[%s196_s21] sm:$0xff]  ;;  %v208_v2 = vld [vmem:[%s196_s21 + $0x8] sm:$0xff]  ;;  %411 = vmatprep.mubr.msk.f32.mxu0 %vm217_vm0, %v205_v0  ;;  %v209_v4 = vld [vmem:[%s196_s21 + $0x10] sm:$0xf] }
  0x12   : > { %v414_v3 = vpack.c.bf16 %v208_v2, %v207_v1  ;;  %v392_v6 = vld [vmem:[%s199_s24] ss:$0 sm:$0xff] }
  0x14   : > { %415 = vmatprep.subr.bf16.mxu0 %v414_v3 }
  0x15   : > { %417 = vmatpush3.bf16.msra.mxu0 %v414_v3 }
  0x16   : > { %409 = vmatprep.subr.msk.mxu0 %vm224_vm1, %v209_v4 }
  0x19   : > { %410 = vmatpush3.msk.msra.mxu0 %vm224_vm1, %v209_v4 }
  0x1a   : > { %412 = vmatmul.mubr.msk.f32.vlgmr.msra.gmra.mrb[0].mxu0 %vm217_vm0, %v206_v5 }
  0xed   : > { %v413_v7 = vpop.f32.mrb[0].mxu0 }
  0xee   : > { %v300_v8 = vadd.f32 %v413_v7, %v392_v6  ;;  %v294_v9 = vpop.f32.mrb[1].mxu0 }
  0xef   : > { %v295_v10 = vadd.f32 %v392_v6, %v294_v9 }
  0xf0   : > { %305 = vst.msk [vmem:[%s204_s27 + $0x8] sm:$0xff] %vm303_vm2, %v300_v8 }
  0xf1   : > { %304 = vst.msk [vmem:[%s204_s27] sm:$0xff] %vm303_vm2, %v295_v10 }
  0xf2 PF: > { %s13_s12 = sadd.s32 1, %s433_s12  }
  0xf3   : > { %p10_p4 = scmp.ge.s32.totalorder %s13_s12, 6  }
  0xf5   :  { %12 = sbr.rel (!%p10_p4) target bundleno = 1 (0x1), region = 68 }

// kernel: sc_layer_forward.3
= control target key start
LH: loop header
LB: loop body
LE: loop exit
PB: predicated region body
PF: predicated region fallthrough
CT: control target
= control target key end

     0   :  { %v553_v3 = vmov 0   ;;  %vm152_vm0 = vcmask 654336   ;;  %vm398_vm1 = vcmask 519168   ;;  %s1009_s0 = inlined_call_operand.vmem [shape: f32[208,576], index: 0, kind: input, shape index: {}]   ;;  %s1010_s1 = inlined_call_operand.vmem [shape: f32[8,208], index: 1, kind: input, shape index: {}]   ;;  %s1011_s2 = inlined_call_operand.vmem [shape: f32[8,1], index: 2, kind: input, shape index: {}]   ;;  %s1012_s3 = inlined_call_operand.vmem [shape: f32[4,576], index: 3, kind: output, shape index: {}]  }
   0x1   :  { %v17_v0 = vld [vmem:[%s1009_s0 + $0x8] sm:$0xff]  ;;  %v22_v1 = vld [vmem:[%s1009_s0 + $0x30] sm:$0xff]  ;;  %v16_v2 = vld [vmem:[%s1009_s0] sm:$0xff]  ;;  %552 = vset.pattern.permute.xlu0 %v553_v3 }
   0x2   :  { %v407_v4 = vpack.c.bf16 %v22_v1, %v17_v0  ;;  %v21_v5 = vld [vmem:[%s1009_s0 + $0x28] sm:$0xff]  ;;  %v27_v6 = vld [vmem:[%s1009_s0 + $0x58] sm:$0xff]  ;;  %v32_v7 = vld [vmem:[%s1009_s0 + $0x80] sm:$0xff] }
   0x3   :  { %v409_v8 = vpack.c.bf16 %v21_v5, %v16_v2  ;;  %v411_v9 = vpack.c.bf16 %v32_v7, %v27_v6  ;;  %v26_v10 = vld [vmem:[%s1009_s0 + $0x50] sm:$0xff]  ;;  %v31_v11 = vld [vmem:[%s1009_s0 + $0x78] sm:$0xff]  ;;  %v37_v12 = vld [vmem:[%s1009_s0 + $0xa8] sm:$0xff] }
   0x4   :  { %408 = vmatprep.subr.bf16.mxu0 %v407_v4  ;;  %v42_v13 = vld [vmem:[%s1009_s0 + $0xd0] sm:$0xff]  ;;  %v413_v14 = vpack.c.bf16 %v31_v11, %v26_v10  ;;  %v36_v16 = vld [vmem:[%s1009_s0 + $0xa0] sm:$0xff]  ;;  %v41_v17 = vld [vmem:[%s1009_s0 + $0xc8] sm:$0xff] }
   0x5   :  { %410 = vmatpush1.bf16.msra.mxu0 %v409_v8  ;;  %v415_v15 = vpack.c.bf16 %v42_v13, %v37_v12  ;;  %v47_v18 = vld [vmem:[%s1009_s0 + $0xf8] sm:$0xff]  ;;  %v52_v19 = vld [vmem:[%s1009_s0 + $0x120] sm:$0xff]  ;;  %v417_v20 = vpack.c.bf16 %v41_v17, %v36_v16  ;;  %v46_v22 = vld [vmem:[%s1009_s0 + $0xf0] sm:$0xff] }
   0x6   :  { %412 = vmatprep.subr.bf16.mxu0 %v411_v9  ;;  %v419_v21 = vpack.c.bf16 %v52_v19, %v47_v18  ;;  %v51_v23 = vld [vmem:[%s1009_s0 + $0x118] sm:$0xff]  ;;  %v57_v24 = vld [vmem:[%s1009_s0 + $0x148] sm:$0xff]  ;;  %v62_v25 = vld [vmem:[%s1009_s0 + $0x170] sm:$0xff] }
   0x7   :  { %v421_v26 = vpack.c.bf16 %v51_v23, %v46_v22  ;;  %v423_v27 = vpack.c.bf16 %v62_v25, %v57_v24  ;;  %v56_v28 = vld [vmem:[%s1009_s0 + $0x140] sm:$0xff]  ;;  %v61_v29 = vld [vmem:[%s1009_s0 + $0x168] sm:$0xff]  ;;  %v67_v30 = vld [vmem:[%s1009_s0 + $0x198] sm:$0xff] }
   0x8   :  { %v72_v31 = vld [vmem:[%s1009_s0 + $0x1c0] sm:$0xff]  ;;  %v425_v32 = vpack.c.bf16 %v61_v29, %v56_v28  ;;  %v19_v33 = vld [vmem:[%s1009_s0 + $0x18] sm:$0xff]  ;;  %v18_v35 = vld [vmem:[%s1009_s0 + $0x10] sm:$0xff] }
   0x9   :  { %414 = vmatpush1.bf16.msra.mxu0 %v413_v14  ;;  %v24_v34 = vld [vmem:[%s1009_s0 + $0x40] sm:$0xff]  ;;  %v427_v36 = vpack.c.bf16 %v72_v31, %v67_v30  ;;  %v66_v37 = vld [vmem:[%s1009_s0 + $0x190] sm:$0xff]  ;;  %v71_v38 = vld [vmem:[%s1009_s0 + $0x1b8] sm:$0xff] }
   0xa   :  { %416 = vmatprep.subr.bf16.mxu0 %v415_v15  ;;  %v459_v39 = vpack.c.bf16 %v24_v34, %v19_v33  ;;  %v23_v40 = vld [vmem:[%s1009_s0 + $0x38] sm:$0xff]  ;;  %v77_v41 = vld [vmem:[%s1009_s0 + $0x1e8] sm:$0xff]  ;;  %v82_v42 = vld [vmem:[%s1009_s0 + $0x210] sm:$0xff]  ;;  %v429_v48 = vpack.c.bf16 %v71_v38, %v66_v37 }
   0xb   :  { %v461_v43 = vpack.c.bf16 %v23_v40, %v18_v35  ;;  %v29_v44 = vld [vmem:[%s1009_s0 + $0x68] sm:$0xff]  ;;  %v34_v45 = vld [vmem:[%s1009_s0 + $0x90] sm:$0xff]  ;;  %v28_v47 = vld [vmem:[%s1009_s0 + $0x60] sm:$0xff]  ;;  %v431_v53 = vpack.c.bf16 %v82_v42, %v77_v41 }
   0xc   :  { %460 = vmatprep.subr.bf16.mxu1 %v459_v39  ;;  %v674_v46 = vld [vmem:[%s1010_s1 + $0x8] sm:$0xff]  ;;  %v76_v49 = vld [vmem:[%s1009_s0 + $0x1e0] sm:$0xff]  ;;  %v463_v51 = vpack.c.bf16 %v34_v45, %v29_v44  ;;  %v87_v54 = vld [vmem:[%s1009_s0 + $0x238] sm:$0xff] }
   0xd   :  { %418 = vmatpush1.bf16.msra.mxu0 %v417_v20  ;;  %v81_v50 = vld [vmem:[%s1009_s0 + $0x208] sm:$0xff]  ;;  %462 = vmatpush1.bf16.msra.mxu1 %v461_v43  ;;  %v39_v56 = vld [vmem:[%s1009_s0 + $0xb8] sm:$0xff]  ;;  %v44_v57 = vld [vmem:[%s1009_s0 + $0xe0] sm:$0xff] }
   0xe   :  { %420 = vmatprep.subr.bf16.mxu0 %v419_v21  ;;  %v33_v52 = vld [vmem:[%s1009_s0 + $0x88] sm:$0xff]  ;;  %404 = vmatprep.mubr.msk.f32.mxu0 %vm152_vm0, %v674_v46  ;;  %v92_v58 = vld [vmem:[%s1009_s0 + $0x260] sm:$0xff]  ;;  %v467_v59 = vpack.c.bf16 %v44_v57, %v39_v56  ;;  %v38_v60 = vld [vmem:[%s1009_s0 + $0xb0] sm:$0xff]  ;;  %v433_v0 = vpack.c.bf16 %v81_v50, %v76_v49 }
   0xf   :  { %v465_v55 = vpack.c.bf16 %v33_v52, %v28_v47  ;;  %464 = vmatprep.subr.bf16.mxu1 %v463_v51  ;;  %v43_v61 = vld [vmem:[%s1009_s0 + $0xd8] sm:$0xff]  ;;  %405 = vmatprep.mubr.msk.f32.mxu1 %vm152_vm0, %v674_v46  ;;  %v49_v62 = vld [vmem:[%s1009_s0 + $0x108] sm:$0xff]  ;;  %v54_v63 = vld [vmem:[%s1009_s0 + $0x130] sm:$0xff]  ;;  %v435_v4 = vpack.c.bf16 %v92_v58, %v87_v54 }
  0x10   :  { %v86_v1 = vld [vmem:[%s1009_s0 + $0x230] sm:$0xff]  ;;  %v91_v2 = vld [vmem:[%s1009_s0 + $0x258] sm:$0xff]  ;;  %v469_v3 = vpack.c.bf16 %v43_v61, %v38_v60  ;;  %v97_v5 = vld [vmem:[%s1009_s0 + $0x288] sm:$0xff]  ;;  %v471_v6 = vpack.c.bf16 %v54_v63, %v49_v62 }
  0x11   :  { %422 = vmatpush1.bf16.msra.mxu0 %v421_v26  ;;  %466 = vmatpush1.bf16.msra.mxu1 %v465_v55  ;;  %v48_v7 = vld [vmem:[%s1009_s0 + $0x100] sm:$0xff]  ;;  %v53_v8 = vld [vmem:[%s1009_s0 + $0x128] sm:$0xff]  ;;  %v102_v9 = vld [vmem:[%s1009_s0 + $0x2b0] sm:$0xff]  ;;  %v437_v12 = vpack.c.bf16 %v91_v2, %v86_v1 }
  0x12   :  { %424 = vmatprep.subr.bf16.mxu0 %v423_v27  ;;  %468 = vmatprep.subr.bf16.mxu1 %v467_v59  ;;  %v59_v10 = vld [vmem:[%s1009_s0 + $0x158] sm:$0xff]  ;;  %v64_v11 = vld [vmem:[%s1009_s0 + $0x180] sm:$0xff]  ;;  %v101_v14 = vld [vmem:[%s1009_s0 + $0x2a8] sm:$0xff]  ;;  %v473_v15 = vpack.c.bf16 %v53_v8, %v48_v7  ;;  %v439_v16 = vpack.c.bf16 %v102_v9, %v97_v5 }
  0x13   :  { %v96_v13 = vld [vmem:[%s1009_s0 + $0x280] sm:$0xff]  ;;  %v107_v17 = vld [vmem:[%s1009_s0 + $0x2d8] sm:$0xff]  ;;  %v475_v18 = vpack.c.bf16 %v64_v11, %v59_v10  ;;  %v58_v19 = vld [vmem:[%s1009_s0 + $0x150] sm:$0xff] }
  0x14   :  { %v63_v20 = vld [vmem:[%s1009_s0 + $0x178] sm:$0xff]  ;;  %v112_v21 = vld [vmem:[%s1009_s0 + $0x300] sm:$0xff]  ;;  %v69_v22 = vld [vmem:[%s1009_s0 + $0x1a8] sm:$0xff]  ;;  %v441_v24 = vpack.c.bf16 %v101_v14, %v96_v13 }
  0x15   :  { %426 = vmatpush1.bf16.msra.mxu0 %v425_v32  ;;  %470 = vmatpush1.bf16.msra.mxu1 %v469_v3  ;;  %v74_v23 = vld [vmem:[%s1009_s0 + $0x1d0] sm:$0xff]  ;;  %v111_v26 = vld [vmem:[%s1009_s0 + $0x2f8] sm:$0xff]  ;;  %v477_v27 = vpack.c.bf16 %v63_v20, %v58_v19  ;;  %v443_v28 = vpack.c.bf16 %v112_v21, %v107_v17  ;;  %v117_v29 = vld [vmem:[%s1009_s0 + $0x328] sm:$0xff]  ;;  %v554_v21 = vmov 0.0|0.0  }
  0x16   :  { %428 = vmatprep.subr.bf16.mxu0 %v427_v36  ;;  %472 = vmatprep.subr.bf16.mxu1 %v471_v6  ;;  %v106_v25 = vld [vmem:[%s1009_s0 + $0x2d0] sm:$0xff]  ;;  %v479_v30 = vpack.c.bf16 %v74_v23, %v69_v22  ;;  %v68_v31 = vld [vmem:[%s1009_s0 + $0x1a0] sm:$0xff]  ;;  %v73_v32 = vld [vmem:[%s1009_s0 + $0x1c8] sm:$0xff] }
  0x17   :  { %v122_v33 = vld [vmem:[%s1009_s0 + $0x350] sm:$0xff]  ;;  %v79_v34 = vld [vmem:[%s1009_s0 + $0x1f8] sm:$0xff]  ;;  %v84_v35 = vld [vmem:[%s1009_s0 + $0x220] sm:$0xff]  ;;  %v445_v36 = vpack.c.bf16 %v111_v26, %v106_v25  ;;  %v481_v39 = vpack.c.bf16 %v73_v32, %v68_v31 }
  0x18   :  { %v116_v37 = vld [vmem:[%s1009_s0 + $0x320] sm:$0xff]  ;;  %v121_v38 = vld [vmem:[%s1009_s0 + $0x348] sm:$0xff]  ;;  %v447_v40 = vpack.c.bf16 %v122_v33, %v117_v29  ;;  %v127_v41 = vld [vmem:[%s1009_s0 + $0x378] sm:$0xff]  ;;  %v483_v42 = vpack.c.bf16 %v84_v35, %v79_v34 }
  0x19   :  { %430 = vmatpush1.bf16.msra.mxu0 %v429_v48  ;;  %474 = vmatpush1.bf16.msra.mxu1 %v473_v15  ;;  %v78_v43 = vld [vmem:[%s1009_s0 + $0x1f0] sm:$0xff]  ;;  %v83_v44 = vld [vmem:[%s1009_s0 + $0x218] sm:$0xff]  ;;  %v132_v45 = vld [vmem:[%s1009_s0 + $0x3a0] sm:$0xff]  ;;  %v449_v49 = vpack.c.bf16 %v121_v38, %v116_v37 }
  0x1a   :  { %432 = vmatprep.subr.bf16.mxu0 %v431_v53  ;;  %476 = vmatprep.subr.bf16.mxu1 %v475_v18  ;;  %v89_v47 = vld [vmem:[%s1009_s0 + $0x248] sm:$0xff]  ;;  %v94_v48 = vld [vmem:[%s1009_s0 + $0x270] sm:$0xff]  ;;  %v131_v51 = vld [vmem:[%s1009_s0 + $0x398] sm:$0xff]  ;;  %v485_v52 = vpack.c.bf16 %v83_v44, %v78_v43  ;;  %v451_v53 = vpack.c.bf16 %v132_v45, %v127_v41 }
  0x1b   :  { %v126_v50 = vld [vmem:[%s1009_s0 + $0x370] sm:$0xff]  ;;  %v137_v54 = vld [vmem:[%s1009_s0 + $0x3c8] sm:$0xff]  ;;  %v487_v55 = vpack.c.bf16 %v94_v48, %v89_v47  ;;  %v88_v56 = vld [vmem:[%s1009_s0 + $0x240] sm:$0xff] }
  0x1c   :  { %v93_v57 = vld [vmem:[%s1009_s0 + $0x268] sm:$0xff]  ;;  %v142_v58 = vld [vmem:[%s1009_s0 + $0x3f0] sm:$0xff]  ;;  %v99_v59 = vld [vmem:[%s1009_s0 + $0x298] sm:$0xff]  ;;  %v453_v61 = vpack.c.bf16 %v131_v51, %v126_v50 }
  0x1d   :  { %434 = vmatpush1.bf16.msra.mxu0 %v433_v0  ;;  %478 = vmatpush1.bf16.msra.mxu1 %v477_v27  ;;  %v104_v60 = vld [vmem:[%s1009_s0 + $0x2c0] sm:$0xff]  ;;  %v489_v63 = vpack.c.bf16 %v93_v57, %v88_v56  ;;  %v455_v1 = vpack.c.bf16 %v142_v58, %v137_v54  ;;  %v141_v2 = vld [vmem:[%s1009_s0 + $0x3e8] sm:$0xff]  ;;  %v103_v5 = vld [vmem:[%s1009_s0 + $0x2b8] sm:$0xff] }
  0x1e   :  { %436 = vmatprep.subr.bf16.mxu0 %v435_v4  ;;  %480 = vmatprep.subr.bf16.mxu1 %v479_v30  ;;  %v136_v62 = vld [vmem:[%s1009_s0 + $0x3c0] sm:$0xff]  ;;  %v491_v3 = vpack.c.bf16 %v104_v60, %v99_v59  ;;  %v98_v4 = vld [vmem:[%s1009_s0 + $0x290] sm:$0xff]  ;;  %v109_v6 = vld [vmem:[%s1009_s0 + $0x2e8] sm:$0xff] }
  0x1f   :  { %v146_v0 = vld [vmem:[%s1011_s2] sm:$0xff]  ;;  %v114_v7 = vld [vmem:[%s1009_s0 + $0x310] sm:$0xff]  ;;  %v457_v8 = vpack.c.bf16 %v141_v2, %v136_v62  ;;  %v493_v10 = vpack.c.bf16 %v103_v5, %v98_v4  ;;  %v25_v11 = vld [vmem:[%s1009_s0 + $0x48] sm:$0xff] }
  0x20   :  { %149 = vperm.xlu0 %552, %v146_v0   ;;  %v20_v9 = vld [vmem:[%s1009_s0 + $0x20] sm:$0xff]  ;;  %v113_v14 = vld [vmem:[%s1009_s0 + $0x308] sm:$0xff]  ;;  %v119_v15 = vld [vmem:[%s1009_s0 + $0x338] sm:$0xff] }
  0x21   :  { %438 = vmatpush1.bf16.msra.mxu0 %v437_v12  ;;  %482 = vmatpush1.bf16.msra.mxu1 %v481_v39  ;;  %v495_v12 = vpack.c.bf16 %v114_v7, %v109_v6  ;;  %v108_v13 = vld [vmem:[%s1009_s0 + $0x2e0] sm:$0xff]  ;;  %v512_v18 = vpack.c.bf16 %v25_v11, %v20_v9  ;;  %v30_v19 = vld [vmem:[%s1009_s0 + $0x70] sm:$0xff]  ;;  %v35_v22 = vld [vmem:[%s1009_s0 + $0x98] sm:$0xff] }
  0x22   :  { %440 = vmatprep.subr.bf16.mxu0 %v439_v16  ;;  %484 = vmatprep.subr.bf16.mxu1 %v483_v42  ;;  %v124_v16 = vld [vmem:[%s1009_s0 + $0x360] sm:$0xff]  ;;  %v497_v20 = vpack.c.bf16 %v113_v14, %v108_v13  ;;  %v123_v25 = vld [vmem:[%s1009_s0 + $0x358] sm:$0xff]  ;;  %v129_v26 = vld [vmem:[%s1009_s0 + $0x388] sm:$0xff] }
  0x23   :  { %v878_v17 = vld [vmem:[%s1010_s1] sm:$0xff]  ;;  %v499_v23 = vpack.c.bf16 %v124_v16, %v119_v15  ;;  %v134_v27 = vld [vmem:[%s1009_s0 + $0x3b0] sm:$0xff]  ;;  %v45_v31 = vld [vmem:[%s1009_s0 + $0xe8] sm:$0xff] }
  0x24   :  { %v40_v29 = vld [vmem:[%s1009_s0 + $0xc0] sm:$0xff]  ;;  %v503_v32 = vpack.c.bf16 %v134_v27, %v129_v26  ;;  %v133_v34 = vld [vmem:[%s1009_s0 + $0x3a8] sm:$0xff]  ;;  %v139_v35 = vld [vmem:[%s1009_s0 + $0x3d8] sm:$0xff] }
  0x25   :  { %442 = vmatpush1.bf16.msra.mxu0 %v441_v24  ;;  %486 = vmatpush1.bf16.msra.mxu1 %v485_v52  ;;  %v118_v24 = vld [vmem:[%s1009_s0 + $0x330] sm:$0xff]  ;;  %v128_v33 = vld [vmem:[%s1009_s0 + $0x380] sm:$0xff]  ;;  %v518_v37 = vpack.c.bf16 %v45_v31, %v40_v29  ;;  %v143_v42 = vld [vmem:[%s1009_s0 + $0x3f8] sm:$0xff] }
  0x26   :  { %444 = vmatprep.subr.bf16.mxu0 %v443_v28  ;;  %488 = vmatprep.subr.bf16.mxu1 %v487_v55  ;;  %v515_v28 = vpack.c.bf16 %v35_v22, %v30_v19  ;;  %v501_v30 = vpack.c.bf16 %v123_v25, %v118_v24  ;;  %v50_v38 = vld [vmem:[%s1009_s0 + $0x110] sm:$0xff]  ;;  %v505_v39 = vpack.c.bf16 %v133_v34, %v128_v33  ;;  %v60_v45 = vld [vmem:[%s1009_s0 + $0x160] sm:$0xff]  ;;  %v65_v47 = vld [vmem:[%s1009_s0 + $0x188] sm:$0xff] }
  0x27   :  { %v524_v48 = vpack.c.bf16 %v65_v47, %v60_v45  ;;  %v75_v50 = vld [vmem:[%s1009_s0 + $0x1d8] sm:$0xff]  ;;  %v80_v52 = vld [vmem:[%s1009_s0 + $0x200] sm:$0xff]  ;;  %v90_v55 = vld [vmem:[%s1009_s0 + $0x250] sm:$0xff] }
  0x28   :  { %v95_v56 = vld [vmem:[%s1009_s0 + $0x278] sm:$0xff]  ;;  %v100_v58 = vld [vmem:[%s1009_s0 + $0x2a0] sm:$0xff]  ;;  %v105_v59 = vld [vmem:[%s1009_s0 + $0x2c8] sm:$0xff] }
  0x29   :  { %446 = vmatpush1.bf16.msra.mxu0 %v445_v36  ;;  %490 = vmatpush1.bf16.msra.mxu1 %v489_v63  ;;  %v144_v36 = vld [vmem:[%s1009_s0 + $0x400] sm:$0xff]  ;;  %v533_v57 = vpack.c.bf16 %v95_v56, %v90_v55  ;;  %v536_v60 = vpack.c.bf16 %v105_v59, %v100_v58  ;;  %v115_v62 = vld [vmem:[%s1009_s0 + $0x318] sm:$0xff]  ;;  %v145_v7 = vld [vmem:[%s1009_s0 + $0x408] sm:$0xff] }
  0x2a   :  { %448 = vmatprep.subr.bf16.mxu0 %v447_v40  ;;  %492 = vmatprep.subr.bf16.mxu1 %v491_v3  ;;  %v55_v40 = vld [vmem:[%s1009_s0 + $0x138] sm:$0xff]  ;;  %v507_v41 = vpack.c.bf16 %v144_v36, %v139_v35  ;;  %v120_v0 = vld [vmem:[%s1009_s0 + $0x340] sm:$0xff]  ;;  %v130_v3 = vld [vmem:[%s1009_s0 + $0x390] sm:$0xff] }
  0x2b   :  { %v521_v43 = vpack.c.bf16 %v55_v40, %v50_v38  ;;  %v135_v4 = vld [vmem:[%s1009_s0 + $0x3b8] sm:$0xff]  ;;  %v140_v6 = vld [vmem:[%s1009_s0 + $0x3e0] sm:$0xff] }
  0x2c   :  { %v545_v5 = vpack.c.bf16 %v135_v4, %v130_v3 }
  0x2d   :  { %450 = vmatpush1.bf16.msra.mxu0 %v449_v49  ;;  %494 = vmatpush1.bf16.msra.mxu1 %v493_v10  ;;  %v70_v49 = vld [vmem:[%s1009_s0 + $0x1b0] sm:$0xff] }
  0x2e   :  { %452 = vmatprep.subr.bf16.mxu0 %v451_v53  ;;  %496 = vmatprep.subr.bf16.mxu1 %v495_v12  ;;  %v527_v51 = vpack.c.bf16 %v75_v50, %v70_v49  ;;  %v85_v53 = vld [vmem:[%s1009_s0 + $0x228] sm:$0xff] }
  0x2f   :  { %v530_v54 = vpack.c.bf16 %v85_v53, %v80_v52 }
  0x31   :  { %454 = vmatpush1.bf16.msra.mxu0 %v453_v61  ;;  %498 = vmatpush1.bf16.msra.mxu1 %v497_v20  ;;  %v110_v61 = vld [vmem:[%s1009_s0 + $0x2f0] sm:$0xff] }
  0x32   :  { %456 = vmatprep.subr.bf16.mxu0 %v455_v1  ;;  %500 = vmatprep.subr.bf16.mxu1 %v499_v23  ;;  %v539_v63 = vpack.c.bf16 %v115_v62, %v110_v61  ;;  %v125_v1 = vld [vmem:[%s1009_s0 + $0x368] sm:$0xff] }
  0x33   :  { %v542_v2 = vpack.c.bf16 %v125_v1, %v120_v0 }
  0x35   :  { %458 = vmatpush1.bf16.msra.mxu0 %v457_v8  ;;  %502 = vmatpush1.bf16.msra.mxu1 %v501_v30  ;;  %v548_v8 = vpack.c.bf16 %v145_v7, %v140_v6 }
  0x36   :  { %511 = vmatprep.subr.bf16.mxu0 %v554_v21  ;;  %504 = vmatprep.subr.bf16.mxu1 %v503_v32 }
  0x38   :  { %221 = vmatmul.mubr.f32.vlgmr.msra.gmra.mrb[0].mxu0 %v878_v17 }
  0x39   :  { %513 = vmatpush1.bf16.msra.mxu0 %v512_v18  ;;  %406 = vmatprep.mubr.msk.f32.mxu0 %vm152_vm0, %v674_v46  ;;  %v138_v46 = vld [vmem:[%s1009_s0 + $0x3d0] sm:$0xff] }
  0x3a   :  { %514 = vmatprep.subr.bf16.mxu0 %v554_v21  ;;  %506 = vmatpush1.bf16.msra.mxu1 %v505_v39  ;;  %v509_v44 = vpack.c.bf16 %v143_v42, %v138_v46 }
  0x3b   :  { %508 = vmatprep.subr.bf16.mxu1 %v507_v41 }
  0x3d   :  { %516 = vmatpush1.bf16.msra.mxu0 %v515_v28 }
  0x3e   :  { %517 = vmatprep.subr.bf16.mxu0 %v554_v21  ;;  %510 = vmatpush1.bf16.msra.mxu1 %v509_v44 }
  0x41   :  { %519 = vmatpush1.bf16.msra.mxu0 %v518_v37  ;;  %292 = vmatmul.mubr.f32.vlgmr.msra.gmra.mrb[0].mxu1 %v878_v17 }
  0x42   :  { %520 = vmatprep.subr.bf16.mxu0 %v554_v21 }
  0x45   :  { %522 = vmatpush1.bf16.msra.mxu0 %v521_v43 }
  0x46   :  { %523 = vmatprep.subr.bf16.mxu0 %v554_v21 }
  0x49   :  { %525 = vmatpush1.bf16.msra.mxu0 %v524_v48 }
  0x4a   :  { %526 = vmatprep.subr.bf16.mxu0 %v554_v21 }
  0x4d   :  { %528 = vmatpush1.bf16.msra.mxu0 %v527_v51 }
  0x4e   :  { %529 = vmatprep.subr.bf16.mxu0 %v554_v21 }
  0x51   :  { %531 = vmatpush1.bf16.msra.mxu0 %v530_v54 }
  0x52   :  { %532 = vmatprep.subr.bf16.mxu0 %v554_v21 }
  0x55   :  { %534 = vmatpush1.bf16.msra.mxu0 %v533_v57 }
  0x56   :  { %535 = vmatprep.subr.bf16.mxu0 %v554_v21 }
  0x59   :  { %537 = vmatpush1.bf16.msra.mxu0 %v536_v60 }
  0x5a   :  { %538 = vmatprep.subr.bf16.mxu0 %v554_v21 }
  0x5d   :  { %540 = vmatpush1.bf16.msra.mxu0 %v539_v63 }
  0x5e   :  { %541 = vmatprep.subr.bf16.mxu0 %v554_v21 }
  0x61   :  { %543 = vmatpush1.bf16.msra.mxu0 %v542_v2 }
  0x62   :  { %544 = vmatprep.subr.bf16.mxu0 %v554_v21 }
  0x65   :  { %546 = vmatpush1.bf16.msra.mxu0 %v545_v5 }
  0x66   :  { %547 = vmatprep.subr.bf16.mxu0 %v554_v21 }
  0x69   :  { %549 = vmatpush1.bf16.msra.mxu0 %v548_v8 }
  0x6c   :  { %363 = vmatmul.mubr.f32.vlgmr.msra.gmra.mrb[2].mxu0 %v878_v17 }
  0x9f   :  { %v150_v9 = vpop.permute.xlu0 %149 }
 0x10b   :  { %v222_v10 = vpop.f32.mrb[0].mxu0 }
 0x10c   :  { %v223_v11 = vadd.f32 %v222_v10, %v150_v9  ;;  %v224_v12 = vpop.f32.mrb[1].mxu0 }
 0x10d   :  { %v225_v13 = vadd.f32 %v224_v12, %v150_v9 }
 0x10e   :  { %v373_v14 = vrot.slane %v223_v11, 4 }
 0x10f   :  { %v374_v15 = vrot.slane %v225_v13, 4 }
 0x110   :  { %v383_v16 = vmul.f32 %v373_v14, %v223_v11 }
 0x111   :  { %v384_v18 = vmul.f32 %v374_v15, %v225_v13 }
 0x113   :  { %v392_v19 = vcombine.low %v383_v16, %v384_v18 }
 0x114   :  { %v293_v20 = vpop.f32.mrb[0].mxu1 }
 0x115   :  { %396 = vst [vmem:[%s1012_s3] sm:$0xff] %v392_v19  ;;  %v294_v22 = vadd.f32 %v293_v20, %v150_v9  ;;  %v295_v21 = vpop.f32.mrb[1].mxu1 }
 0x116   :  { %v296_v23 = vadd.f32 %v295_v21, %v150_v9 }
 0x117   :  { %v375_v24 = vrot.slane %v294_v22, 4 }
 0x118   :  { %v376_v17 = vrot.slane %v296_v23, 4 }
 0x119   :  { %v385_v25 = vmul.f32 %v375_v24, %v294_v22 }
 0x11a   :  { %v386_v26 = vmul.f32 %v376_v17, %v296_v23 }
 0x11c   :  { %v393_v27 = vcombine.low %v385_v25, %v386_v26 }
 0x11e   :  { %397 = vst [vmem:[%s1012_s3 + $0x8] sm:$0xff] %v393_v27 }
 0x13f   :  { %v364_v28 = vpop.f32.mrb[2].mxu0 }
 0x140   :  { %v365_v29 = vadd.f32 %v364_v28, %v150_v9  ;;  %v366_v30 = vpop.f32.mrb[3].mxu0 }
 0x142   :  { %v377_v31 = vrot.slane %v365_v29, 4 }
 0x144   :  { %v387_v32 = vmul.f32 %v377_v31, %v365_v29 }
 0x146   :  { %399 = vst.msk [vmem:[%s1012_s3 + $0x10] sm:$0xf] %vm398_vm1, %v387_v32 }

</bundles_post_ra>
